<compile_context>
chip_gen: v7x
topology: tpu7x:2x2x1
jax: 0.10.0
libtpu: 0.0.40
codegen_flags: <defaults>
</compile_context>

<pallas_src>
import jax
import jax.numpy as jnp
from jax.experimental import pallas as pl
from jax.experimental.pallas import tpu as pltpu


def _apply_activations_kernel(x_ref, act_ref, o_ref):
    # x_ref: (TB, TD) tile, act_ref: (TB, 1) tile, both in VMEM.
    # Implicit lane-broadcast of the activation column across the feature
    # (lane) axis feeds the VPU directly; no tiled (TB, TD) intermediate.
    o_ref[...] = (x_ref[...] * act_ref[...]).astype(o_ref.dtype)


def _choose_tiles(B, D, itemsize, target_block_bytes):
    """Pick (TB, TD) so the x block is ~target_block_bytes.

    Lane axis (TD) grows first (it is the fast/lane axis; keep it a large
    multiple of 128 or the full dim), then TB fills the rest of the byte
    budget. TB is either the full batch dim or a multiple of 32 (legal sublane
    tiling for f32 / bf16 / int8). Ragged edges handled by pl.cdiv + padding.
    """
    TD_CAP = 4096  # multiple of 128
    if D <= TD_CAP:
        TD = D                      # full feature dim -> always a legal block
    else:
        TD = TD_CAP

    tb_target = max(1, target_block_bytes // max(1, TD * itemsize))
    tb_target = min(tb_target, 4096)  # cap so the lane-padded (TB,1) act
    if B <= tb_target:                # buffers stay small when D is tiny
        TB = B                        # full batch dim -> always legal
    else:
        TB = min(B, max(32, (tb_target // 32) * 32))
    return TB, TD


def apply_activations(x, act, thres_act=0.001, *, force_pallas=False,
                      donate_x=False, target_block_bytes=4 << 20):
    """Pallas equivalent of the PyTorch apply_activations.forward.

    Args:
      x:   (B, D) array.
      act: (B, 1) array (per-sample activation).
      thres_act: kept for interface parity; unused in forward (as in PyTorch).
      force_pallas: skip the small-size plain-JAX fast path (for testing).
      donate_x: if True and no dtype promotion occurs, alias the output to x's
        HBM buffer (caller must not reuse x afterwards).
      target_block_bytes: target size of one x block in VMEM (~2-8 MiB).
    Returns:
      (B, D) array: tile(act, (1, D)) * x.
    """
    del thres_act  # unused in the forward pass, mirroring the PyTorch module
    B, D = x.shape
    assert act.shape == (B, 1), f"act must be (B, 1), got {act.shape}"
    out_dtype = jnp.result_type(x.dtype, act.dtype)

    # Small / fusible problems: a standalone mem-bound broadcast-multiply can
    # at best tie XLA's fused elementwise op, and below a couple of M elements
    # the pallas_call launch + per-step overhead dominates. Let XLA fuse it.
    if not force_pallas and (B * D) <= (2 * 1024 * 1024):
        return (act * x).astype(out_dtype)

    x_itemsize = jnp.dtype(x.dtype).itemsize
    out_itemsize = jnp.dtype(out_dtype).itemsize
    act_itemsize = jnp.dtype(act.dtype).itemsize

    TB, TD = _choose_tiles(B, D, x_itemsize, target_block_bytes)
    grid = (pl.cdiv(B, TB), pl.cdiv(D, TD))

    cost = pl.CostEstimate(
        flops=B * D,
        transcendentals=0,
        bytes_accessed=(B * D * x_itemsize          # read x
                        + B * D * out_itemsize      # write out
                        + B * act_itemsize),        # read act
    )

    kwargs = {}
    if donate_x and x.dtype == out_dtype:
        # x and out share shape/dtype: reuse x's HBM buffer for the output
        # (saves a second B x D HBM allocation; peak-memory headroom on v7x/v5e).
        kwargs["input_output_aliases"] = {0: 0}

    return pl.pallas_call(
        _apply_activations_kernel,
        out_shape=jax.ShapeDtypeStruct((B, D), out_dtype),
        grid_spec=pl.GridSpec(
            grid=grid,
            # Grid order is load-bearing: batch outer, feature inner, so the
            # act block index (i, 0) stays constant across the inner axis and
            # its (lane-padded ~128x) DMA is issued once per row band rather
            # than on every grid step. Do NOT reorder to (D-tiles, B-tiles).
            in_specs=[
                pl.BlockSpec((TB, TD), lambda i, j: (i, j)),   # x tile
                pl.BlockSpec((TB, 1), lambda i, j: (i, 0)),    # act column
            ],
            out_specs=pl.BlockSpec((TB, TD), lambda i, j: (i, j)),
        ),
        compiler_params=pltpu.CompilerParams(
            # Pure elementwise op: no cross-tile dependency, both grid axes
            # parallel (lets v7x shard the grid across its 2 TensorCores).
            dimension_semantics=("parallel", "parallel"),
            # ~4 MiB x blocks, double-buffered x + out (~4x tile) plus the
            # lane-padded act buffers: ~20 MiB peak. 40 MiB exceeds v5e's
            # 16 MiB default scoped limit and stays well under v7x's 64 MiB
            # physical VMEM.
            vmem_limit_bytes=40 * 1024 * 1024,
        ),
        cost_estimate=cost,
        **kwargs,
    )(x, act)


if __name__ == "__main__":
    key = jax.random.PRNGKey(0)
    kx, ka = jax.random.split(key)

    # Small shapes consistent with the module's 2-D (batch, features) forward.
    B, D = 8, 256
    x = jax.random.normal(kx, (B, D), dtype=jnp.float32)
    act = jax.random.uniform(ka, (B, 1), dtype=jnp.float32)

    out = apply_activations(x, act, thres_act=0.001, force_pallas=True)
    out = jax.block_until_ready(out)

    ref = jnp.tile(act, (1, D)) * x   # exact torch.tile semantics
    assert out.shape == (B, D)
    assert jnp.allclose(out, ref, atol=1e-6, rtol=1e-6), "mismatch vs reference"

    # Exercise the multi-tile / ragged-edge path: TD=4096 (ragged 128 on the
    # last feature block), TB=256 (ragged 8 on the last batch block).
    B2, D2 = 520, 4224
    x2 = jax.random.normal(kx, (B2, D2), dtype=jnp.float32)
    act2 = jax.random.uniform(ka, (B2, 1), dtype=jnp.float32)
    out2 = jax.block_until_ready(
        apply_activations(x2, act2, thres_act=0.001, force_pallas=True))
    ref2 = jnp.tile(act2, (1, D2)) * x2
    assert jnp.allclose(out2, ref2, atol=1e-6, rtol=1e-6), "ragged tile mismatch"

    # Donated-x path (aliased HBM output buffer).
    out3 = jax.block_until_ready(
        apply_activations(x, act, force_pallas=True, donate_x=True))
    assert jnp.allclose(out3, ref, atol=1e-6, rtol=1e-6), "donate_x mismatch"

    print("KERNEL_OK")
</pallas_src>

<mosaic_0001>
module attributes {stable_mosaic.version = 11 : i64} {
  func.func @_apply_activations_kernel(%arg0: i32, %arg1: i32, %arg2: memref<8x256xf32, #tpu.memory_space<vmem>>, %arg3: memref<8x1xf32, #tpu.memory_space<vmem>>, %arg4: memref<8x256xf32, #tpu.memory_space<vmem>>) attributes {dimension_semantics = [#tpu.dimension_semantics<parallel>, #tpu.dimension_semantics<parallel>], iteration_bounds = array<i64: 1, 1>, scalar_prefetch = 0 : i64, scratch_operands = 0 : i64, tpu.core_type = #tpu.core_type<tc>, window_params = [{transform_indices = @transform_0, window_bounds = array<i64: 8, 256>}, {transform_indices = @transform_1, window_bounds = array<i64: 8, 1>}, {transform_indices = @transform_2, window_bounds = array<i64: 8, 256>}]} {
    %c0 = arith.constant 0 : index
    %c0_0 = arith.constant 0 : index
    %0 = vector.load %arg2[%c0, %c0_0] : memref<8x256xf32, #tpu.memory_space<vmem>>, vector<8x256xf32>
    %c0_1 = arith.constant 0 : index
    %c0_2 = arith.constant 0 : index
    %1 = vector.load %arg3[%c0_1, %c0_2] : memref<8x1xf32, #tpu.memory_space<vmem>>, vector<8x1xf32>
    %2 = vector.broadcast %1 : vector<8x1xf32> to vector<8x256xf32>
    %3 = arith.mulf %0, %2 : vector<8x256xf32>
    %c0_3 = arith.constant 0 : index
    %c0_4 = arith.constant 0 : index
    %4 = vector.load %arg4[%c0_3, %c0_4] : memref<8x256xf32, #tpu.memory_space<vmem>>, vector<8x256xf32>
    tpu.vector_store %arg4[%c0_3, %c0_4], %3 {strides = array<i32>} : memref<8x256xf32, #tpu.memory_space<vmem>>, vector<8x256xf32>,
    return
  }
  func.func @transform_0(%arg0: i32, %arg1: i32) -> (i32, i32) {
    %c0_i32 = arith.constant 0 : i32
    return %arg0, %arg1 : i32, i32
  }
  func.func @transform_1(%arg0: i32, %arg1: i32) -> (i32, i32) {
    %c0_i32 = arith.constant 0 : i32
    %c0_i32_0 = arith.constant 0 : i32
    return %arg0, %c0_i32 : i32, i32
  }
  func.func @transform_2(%arg0: i32, %arg1: i32) -> (i32, i32) {
    %c0_i32 = arith.constant 0 : i32
    return %arg0, %arg1 : i32, i32
  }
}

</mosaic_0001>

<bundles_post_ra>
// kernel: tpu_custom_call.1
= control target key start
LH: loop header
LB: loop body
LE: loop exit
PB: predicated region body
PF: predicated region fallthrough
CT: control target
= control target key end

     0   :  { %7 = vsyncpa [#allocation3], 0  ;;  %s148_s0 = inlined_call_operand.hbm [shape: f32[8,256], index: 0, kind: input, shape index: {}]   ;;  %s149_s1 = inlined_call_operand.vmem [shape: f32[8,1], index: 1, kind: input, shape index: {}]   ;;  %s150_s2 = inlined_call_operand.hbm [shape: f32[8,256], index: 2, kind: output, shape index: {}]  }
   0x1   :  { %8 = vsyncpa [#allocation4], 0  ;;  %s103_s9 = smov [#allocation2]   ;;  %s55_s13 = scalar_lea.hbm %s148_s0, 256 }
   0x2   :  { %s15_s10 = sshll.u32 %s103_s9, 4  ;;  %p56_p0 = scmp.ne.s32.totalorder %s148_s0, %s55_s13  ;;  %s16_s10 = int_to_ptr.vmem [resolvable:$true] %s15_s10 }
   0x3   :  { %p59_p1 = scmp.lt.u32.totalorder %s55_s13, %s148_s0 }
   0x5   :  { %p61_p2 = pnand %p59_p1, %p56_p0 }
   0x7   :  { %64 = shalt.err (!%p61_p2)
}
   0x8   :  { %s65_s18 = scalar_lea.vmem %s16_s10, 256  ;;  %p70_p4 = scmp.lt.s32.totalorder %s16_s10, %s16_s10 }
   0x9   :  { %p66_p3 = scmp.ne.s32.totalorder %s16_s10, %s65_s18  ;;  %p71_p5 = scmp.lt.s32.totalorder %s65_s18, %s65_s18 }
   0xb   :  { %p72_p6 = por %p71_p5, %p70_p4 }
   0xd   :  { %p73_p7 = pnand %p72_p6, %p66_p3 }
   0xf   :  { %76 = shalt.err (!%p73_p7)
}
  0x10   :  { %18 = dma.hbm_to_vmem [thread:$0]  %s148_s0, 256, %s16_s10, [#allocation3]  }
  0x11   :  { %99 = dma.done.wait [#allocation3], 256  }
  0x12   :  { %100 = vsyncadd [#allocation3], 4294967040  ;;  %v104_v0 = vmov 0   ;;  %v26_v1 = vld [vmem:[%s149_s1] sm:$0xff]  ;;  %v25_v3 = vld [vmem:[#allocation2 + $0x8] sm:$0xff]  ;;  %s105_s23 = smov [#allocation5]  }
  0x13   :  { %54 = vset.pattern.permute.xlu0 %v104_v0  ;;  %v24_v2 = vld [vmem:[#allocation2] sm:$0xff]  ;;  %s42_s24 = sshll.u32 %s105_s23, 4  ;;  %s43_s24 = int_to_ptr.vmem [resolvable:$true] %s42_s24 }
  0x14   :  { %29 = vperm.xlu0 %54, %v26_v1   ;;  %s77_s0 = scalar_lea.vmem %s43_s24, 256  ;;  %p82_p9 = scmp.lt.s32.totalorder %s43_s24, %s43_s24 }
  0x15   :  { %p78_p8 = scmp.ne.s32.totalorder %s43_s24, %s77_s0  ;;  %p83_p10 = scmp.lt.s32.totalorder %s77_s0, %s77_s0 }
  0x17   :  { %p84_p11 = por %p83_p10, %p82_p9 }
  0x19   :  { %p85_p12 = pnand %p84_p11, %p78_p8 }
  0x93   :  { %v30_v4 = vpop.permute.xlu0 %29 }
  0x94   :  { %v32_v5 = vmul.f32 %v30_v4, %v24_v2  ;;  %v33_v6 = vmul.f32 %v30_v4, %v25_v3 }
  0x96   :  { %34 = vst [vmem:[#allocation5] sm:$0xff] %v32_v5  ;;  %35 = vst [vmem:[#allocation5 + $0x8] sm:$0xff] %v33_v6 }
  0x97   :  { %88 = shalt.err (!%p85_p12)
}
  0x98   :  { %s89_s26 = scalar_lea.hbm %s150_s2, 256 }
  0x99   :  { %p90_p13 = scmp.ne.s32.totalorder %s150_s2, %s89_s26  ;;  %p93_p0 = scmp.lt.u32.totalorder %s89_s26, %s150_s2 }
  0x9b   :  { %p95_p1 = pnand %p93_p0, %p90_p13 }
  0x9d   :  { %98 = shalt.err (!%p95_p1)
}
  0x9e   :  { %45 = dma.vmem_to_hbm [thread:$0]  %s43_s24, 256, %s150_s2, [#allocation4]  }
  0x9f   :  { %101 = dma.done.wait [#allocation4], 256  }
  0xa0   :  { %102 = vsyncadd [#allocation4], 4294967040 }
  0xa1   :  { %49 = vsyncpa [#allocation3], 1 }
  0xa2   :  { %50 = vsyncpa [#allocation4], 1 }

</bundles_post_ra>
